<compile_context>
chip_gen: v6e
topology: v6e:2x2x1
jax: 0.10.0
libtpu: 0.0.40
codegen_flags: <defaults>
</compile_context>

<pallas_src>
import jax
import jax.numpy as jnp
from jax.experimental import pallas as pl
from jax.experimental.pallas import tpu as pltpu


N_PAD = 128  # lane-dense padded output width (true output width is 2)


def _round_up(x: int, m: int) -> int:
    return (x + m - 1) // m * m


def _sublane_pack(dtype) -> int:
    # Rows per packed sublane tile: 8 for f32, 16 for bf16, 32 for int8/fp8.
    return 8 * (4 // jnp.dtype(dtype).itemsize)


def nsp_kernel(x_ref, w_ref, b_ref, o_ref):
    # x_ref: [TB, H]   w_ref: [H, N_PAD]   b_ref: [1, N_PAD]   o_ref: [TB, N_PAD]
    acc = jnp.dot(x_ref[...], w_ref[...], preferred_element_type=jnp.float32)
    o_ref[...] = (acc + b_ref[...]).astype(o_ref.dtype)


def next_sentence_pred(x, weight, bias, *, block_b: int = 2048,
                       compute_dtype=jnp.bfloat16):
    """BERT NSP head forward.

    x:      [B, H]  activations (the <cls> token row per example)
    weight: [2, H]  (PyTorch nn.Linear layout)
    bias:   [2]
    returns [B, 2]  (dtype follows compute_dtype; f32 if compute_dtype=None)
    """
    B, H = x.shape
    if compute_dtype is not None:
        x = x.astype(compute_dtype)
    dtype = x.dtype
    pack = _sublane_pack(dtype)

    # Batch tile: multiple of the sublane packing, capped at block_b, and
    # capped at ~B/2 so there are always >= 2 grid tiles (v7x megacore).
    tb = max(pack, min(block_b, _round_up(pl.cdiv(B, 2), pack)))
    grid = (pl.cdiv(B, tb),)  # partial edge block is masked by Pallas

    # Lane-dense resident parameters: W^T zero-padded to [H, 128], bias kept
    # in f32 so the bias add (and MXU accumulate) stay full precision.
    w_pad = jnp.zeros((H, N_PAD), dtype).at[:, :2].set(weight.T.astype(dtype))
    b_pad = jnp.zeros((1, N_PAD), jnp.float32).at[:, :2].set(
        bias.astype(jnp.float32))

    out_padded = pl.pallas_call(
        nsp_kernel,
        out_shape=jax.ShapeDtypeStruct((B, N_PAD), dtype),
        grid_spec=pltpu.PrefetchScalarGridSpec(
            num_scalar_prefetch=0,
            grid=grid,
            in_specs=[
                pl.BlockSpec((tb, H), lambda i: (i, 0)),      # X: streamed per tile
                pl.BlockSpec((H, N_PAD), lambda i: (0, 0)),   # W^T: resident
                pl.BlockSpec((1, N_PAD), lambda i: (0, 0)),   # bias: resident
            ],
            out_specs=pl.BlockSpec((tb, N_PAD), lambda i: (i, 0)),
        ),
        compiler_params=pltpu.CompilerParams(
            dimension_semantics=("parallel",),  # batch tiles are independent
        ),
    )(x, w_pad, b_pad)

    return out_padded[:, :2]


if __name__ == "__main__":
    # Small shapes consistent with the module's forward contract.
    batch_size, num_steps, num_hiddens = 2, 8, 32

    key = jax.random.PRNGKey(0)
    k_x, k_w, k_b, k_x2 = jax.random.split(key, 4)

    # Deterministic synthetic parameters (nn.Linear(num_hiddens, 2) shapes).
    bound = 1.0 / (num_hiddens ** 0.5)
    weight = jax.random.uniform(k_w, (2, num_hiddens), jnp.float32, -bound, bound)
    bias = jax.random.uniform(k_b, (2,), jnp.float32, -bound, bound)

    # encoded_X: [batch, num_steps, num_hiddens]; NSP consumes the <cls> token.
    encoded_x = jax.random.normal(
        k_x, (batch_size, num_steps, num_hiddens), jnp.float32
    )
    cls_x = encoded_x[:, 0, :]  # [batch, num_hiddens]

    nsp_jit = jax.jit(next_sentence_pred,
                      static_argnames=("block_b", "compute_dtype"))

    # Default (bf16 compute) path — loose tolerance appropriate for bf16.
    y_hat = jax.block_until_ready(nsp_jit(cls_x, weight, bias))
    assert y_hat.shape == (batch_size, 2)
    y_ref = cls_x @ weight.T + bias
    assert jnp.allclose(y_hat.astype(jnp.float32), y_ref, atol=2e-2, rtol=2e-2)

    # Exact f32 path + ragged batch: exercises multi-tile grid and the masked
    # partial edge block (no jnp.pad anywhere).
    B2, H2 = 300, 128
    bound2 = 1.0 / (H2 ** 0.5)
    w2 = jax.random.uniform(k_w, (2, H2), jnp.float32, -bound2, bound2)
    b2 = jax.random.uniform(k_b, (2,), jnp.float32, -bound2, bound2)
    x2 = jax.random.normal(k_x2, (B2, H2), jnp.float32)

    y2 = jax.block_until_ready(
        nsp_jit(x2, w2, b2, block_b=128, compute_dtype=None))
    y2_ref = x2 @ w2.T + b2
    assert y2.shape == (B2, 2)
    assert jnp.allclose(y2, y2_ref, atol=1e-5, rtol=1e-5)

    print("KERNEL_OK")
</pallas_src>

<mosaic_0001>
module attributes {stable_mosaic.version = 11 : i64} {
  func.func @nsp_kernel(%arg0: i32, %arg1: memref<16x32xbf16, #tpu.memory_space<vmem>>, %arg2: memref<32x128xbf16, #tpu.memory_space<vmem>>, %arg3: memref<1x128xf32, #tpu.memory_space<vmem>>, %arg4: memref<16x128xbf16, #tpu.memory_space<vmem>>) attributes {dimension_semantics = [#tpu.dimension_semantics<parallel>], iteration_bounds = array<i64: 1>, scalar_prefetch = 0 : i64, scratch_operands = 0 : i64, tpu.core_type = #tpu.core_type<tc>, window_params = [{transform_indices = @transform_0, window_bounds = array<i64: 16, 32>}, {pipeline_mode = #tpu.pipeline_mode<synchronous>, transform_indices = @transform_1, window_bounds = array<i64: 32, 128>}, {pipeline_mode = #tpu.pipeline_mode<synchronous>, transform_indices = @transform_2, window_bounds = array<i64: 1, 128>}, {transform_indices = @transform_3, window_bounds = array<i64: 16, 128>}]} {
    %c0 = arith.constant 0 : index
    %c0_0 = arith.constant 0 : index
    %0 = vector.load %arg1[%c0, %c0_0] : memref<16x32xbf16, #tpu.memory_space<vmem>>, vector<16x32xbf16>
    %c0_1 = arith.constant 0 : index
    %c0_2 = arith.constant 0 : index
    %1 = vector.load %arg2[%c0_1, %c0_2] : memref<32x128xbf16, #tpu.memory_space<vmem>>, vector<32x128xbf16>
    %cst = arith.constant dense<0.000000e+00> : vector<16x128xf32>
    %2 = tpu.matmul %0, %1, %cst {dimension_numbers = #tpu.dot_dimension_numbers<[1], [0], [0], [1], [0, 0, 1, 1], [], []>} : vector<16x32xbf16>, vector<32x128xbf16>, vector<16x128xf32> -> vector<16x128xf32>
    %c0_3 = arith.constant 0 : index
    %c0_4 = arith.constant 0 : index
    %3 = vector.load %arg3[%c0_3, %c0_4] : memref<1x128xf32, #tpu.memory_space<vmem>>, vector<1x128xf32>
    %4 = vector.broadcast %3 : vector<1x128xf32> to vector<16x128xf32>
    %5 = arith.addf %2, %4 : vector<16x128xf32>
    %6 = arith.truncf %5 : vector<16x128xf32> to vector<16x128xbf16>
    %c0_5 = arith.constant 0 : index
    %c0_6 = arith.constant 0 : index
    %7 = vector.load %arg4[%c0_5, %c0_6] : memref<16x128xbf16, #tpu.memory_space<vmem>>, vector<16x128xbf16>
    tpu.vector_store %arg4[%c0_5, %c0_6], %6 {strides = array<i32>} : memref<16x128xbf16, #tpu.memory_space<vmem>>, vector<16x128xbf16>,
    return
  }
  func.func @transform_0(%arg0: i32) -> (i32, i32) {
    %c0_i32 = arith.constant 0 : i32
    %c0_i32_0 = arith.constant 0 : i32
    return %arg0, %c0_i32 : i32, i32
  }
  func.func @transform_1(%arg0: i32) -> (i32, i32) {
    %c0_i32 = arith.constant 0 : i32
    %c0_i32_0 = arith.constant 0 : i32
    %c0_i32_1 = arith.constant 0 : i32
    return %c0_i32, %c0_i32_0 : i32, i32
  }
  func.func @transform_2(%arg0: i32) -> (i32, i32) {
    %c0_i32 = arith.constant 0 : i32
    %c0_i32_0 = arith.constant 0 : i32
    %c0_i32_1 = arith.constant 0 : i32
    return %c0_i32, %c0_i32_0 : i32, i32
  }
  func.func @transform_3(%arg0: i32) -> (i32, i32) {
    %c0_i32 = arith.constant 0 : i32
    %c0_i32_0 = arith.constant 0 : i32
    return %arg0, %c0_i32 : i32, i32
  }
}

</mosaic_0001>

<bundles_post_ra>
// kernel: next_sentence_pred.1
= control target key start
LH: loop header
LB: loop body
LE: loop exit
PB: predicated region body
PF: predicated region fallthrough
CT: control target
= control target key end

     0   :  { %8 = vsyncpa [#allocation3], 0  ;;  %v282_v1 = vmov 0.0   ;;  %v50_v3 = vlaneseq  ;;  %vm283_vm0 = vmmov 0   ;;  %v284_v12 = vmov 1966171168   ;;  %s344_s0 = inlined_call_operand.vmem [shape: bf16[2,32], index: 0, kind: input, shape index: {}]   ;;  %s345_s1 = inlined_call_operand.vmem [shape: bf16[32,128], index: 1, kind: input, shape index: {}]   ;;  %s346_s2 = inlined_call_operand.vmem [shape: f32[1,128], index: 2, kind: input, shape index: {}]   ;;  %s347_s3 = inlined_call_operand.hbm [shape: bf16[2,128], index: 3, kind: output, shape index: {}]  }
   0x1   :  { %v258_v0 = vld [vmem:[%s345_s1 + $0x8] sm:$0xff]   ;;  %244 = vmatprep.subr.bf16.mxu0 %v282_v1  ;;  %v259_v2 = vld [vmem:[%s345_s1] sm:$0xff]   ;;  %248 = vmatprep.mubr.msk.bf16.mxu0 %vm283_vm0, %v282_v1  ;;  %v48_v13 = vunpack.c.l.s4 %v284_v12  ;;  %vm104_vm1 = vcmask 261120  }
   0x2   :  { %245 = vmatpush3.bf16.msra.mxu0 %v258_v0  ;;  %v16_v4 = vld [vmem:[%s344_s0] sm:$0x1]  ;;  %v17_v5 = vld [vmem:[%s344_s0 + $0x1] sm:$0x1]  ;;  %v18_v6 = vld [vmem:[%s344_s0 + $0x2] sm:$0x1] }
   0x3   :  { %246 = vmatprep.subr.bf16.mxu0 %v282_v1  ;;  %v19_v7 = vld [vmem:[%s344_s0 + $0x3] sm:$0x1]  ;;  %v20_v8 = vld [vmem:[%s344_s0 + $0x4] sm:$0x1]  ;;  %v21_v9 = vld [vmem:[%s344_s0 + $0x5] sm:$0x1]  ;;  %v43_v15 = vcombine.low %v16_v4, %v17_v5  ;;  %v49_v19 = vunpack.c.0.s8 %v48_v13 }
   0x4   :  { %v22_v10 = vld [vmem:[%s344_s0 + $0x6] sm:$0x1]  ;;  %v23_v11 = vld [vmem:[%s344_s0 + $0x7] sm:$0x1]  ;;  %v51_v14 = vshrl.u32 %v50_v3, 7  ;;  %v44_v16 = vcombine.low %v18_v6, %v19_v7  ;;  %v45_v17 = vcombine.low %v20_v8, %v21_v9 }
   0x5   :  { %v46_v18 = vcombine.low %v22_v10, %v23_v11  ;;  %v232_v31 = vld [vmem:[%s346_s2] ss:$0 sm:$0xff] }
   0x6   :  { %247 = vmatpush3.bf16.msra.mxu0 %v259_v2  ;;  %v52_v20 = vsub.s32 %v49_v19, %v51_v14 }
   0x8   :  { %v53_v21 = vrot.slane %v43_v15, %v52_v20  ;;  %v60_v22 = vrot.slane %v44_v16, %v52_v20  ;;  %v67_v23 = vrot.slane %v45_v17, %v52_v20  ;;  %v74_v24 = vrot.slane %v46_v18, %v52_v20 }
   0xa   :  { %v75_v25 = vcombine.low %v53_v21, %v60_v22  ;;  %v76_v26 = vcombine.low %v67_v23, %v74_v24 }
   0xc   :  { %v83_v27 = vrot.slane %v75_v25, %v52_v20  ;;  %v90_v28 = vrot.slane %v76_v26, %v52_v20 }
   0xe   :  { %v91_v29 = vcombine.low %v83_v27, %v90_v28 }
  0x10   :  { %249 = vmatmul.mubr.msk.bf16.vlgmr.msra.gmra.mxu0 %vm104_vm1, %v91_v29 }
  0xd0   :  { %v142_v30 = vpop.f32.mrf.mxu0 }
  0xd1   :  { %v143_v34 = vadd.f32 %v232_v31, %v142_v30 }
  0xd2   :  { %v250_v32 = vpop.f32.mrf.mxu0 }
  0xd4   :  { %v145_v33 = vpop.f32.mrf.mxu0 }
  0xd5   :  { %v146_v35 = vadd.f32 %v232_v31, %v145_v33 }
  0xd6   :  { %v251_v36 = vpop.f32.mrf.mxu0 }
  0xd7   :  { %v149_v37 = vpack.c.bf16 %v146_v35, %v143_v34  ;;  %v236_v38 = vpack.c.bf16 %v146_v35, %v146_v35 }
  0xd9   :  { %v158_v39 = vrot.slane %v149_v37, %v52_v20  ;;  %v165_v40 = vrot.slane %v236_v38, %v52_v20 }
  0xdb   :  { %v166_v41 = vcombine.high %v158_v39, %v158_v39  ;;  %v167_v42 = vcombine.high %v165_v40, %v165_v40  ;;  %v174_v43 = vrot.slane %v158_v39, %v52_v20  ;;  %v181_v44 = vrot.slane %v165_v40, %v52_v20  ;;  %237 = vst.sshfl [vmem:[#allocation2] sm:$0x1 pattern:$0x73625140] %v158_v39 }
  0xdc   :  { %239 = vst.sshfl [vmem:[#allocation2 + $0x4] sm:$0x1 pattern:$0x73625140] %v165_v40 }
  0xdd   :  { %v188_v45 = vrot.slane %v166_v41, %v52_v20  ;;  %v195_v46 = vrot.slane %v167_v42, %v52_v20  ;;  %v196_v47 = vcombine.high %v174_v43, %v174_v43  ;;  %v197_v48 = vcombine.high %v181_v44, %v181_v44  ;;  %238 = vst.sshfl [vmem:[#allocation2 + $0x1] sm:$0x1 pattern:$0x73625140] %v166_v41 }
  0xde   :  { %240 = vst.sshfl [vmem:[#allocation2 + $0x5] sm:$0x1 pattern:$0x73625140] %v167_v42 }
  0xdf   :  { %v198_v49 = vcombine.high %v188_v45, %v188_v45  ;;  %v199_v50 = vcombine.high %v195_v46, %v195_v46  ;;  %210 = vst [vmem:[#allocation2 + $0x2] sm:$0x1] %v196_v47  ;;  %214 = vst [vmem:[#allocation2 + $0x6] sm:$0x1] %v197_v48 }
  0xe1   :  { %211 = vst [vmem:[#allocation2 + $0x3] sm:$0x1] %v198_v49  ;;  %215 = vst [vmem:[#allocation2 + $0x7] sm:$0x1] %v199_v50 }
  0xe2   :  { %220 = vsyncadd [#allocation3], 112  ;;  %s285_s2 = smov [#allocation2]  }
  0xe3   :  { %s221_s5 = sshll.u32 %s285_s2, 4  ;;  %s222_s5 = int_to_ptr.vmem [resolvable:$true] %s221_s5 }
  0xe4   :  { %s260_s6 = scalar_lea.vmem %s222_s5, 16  ;;  %s264_s7 = scalar_lea.vmem %s222_s5, 128 }
  0xe5   :  { %p261_p0 = scmp.ne.s32.totalorder %s222_s5, %s260_s6  ;;  %p265_p1 = scmp.lt.s32.totalorder %s222_s5, %s222_s5 }
  0xe6   :  { %p266_p2 = scmp.lt.s32.totalorder %s264_s7, %s260_s6 }
  0xe8   :  { %p267_p3 = por %p266_p2, %p265_p1 }
  0xea   :  { %p268_p4 = pnand %p267_p3, %p261_p0 }
  0xec   :  { %271 = shalt.err (!%p268_p4)
}
  0xed   :  { %s286_s8 = smov 16   ;;  %s287_s9 = smov 1  }
  0xee   :  { %227 = dma.vmem_to_hbm [thread:$0]  %s222_s5, 16, %s347_s3, [#allocation3], %s286_s8, %s286_s8, %s287_s9  }
  0xef   :  { %280 = dma.done.wait [#allocation3], 128  }
  0xf0   :  { %281 = vsyncadd [#allocation3], 4294967168 }
  0xf1   :  { %231 = vsyncpa [#allocation3], 1 }

</bundles_post_ra>
